<compile_context>
chip_gen: v5e
topology: v5e:2x2
jax: 0.10.0
libtpu: 0.0.40
codegen_flags: <defaults>
</compile_context>

<pallas_src>
import jax
import jax.numpy as jnp
from jax.experimental import pallas as pl
from jax.experimental.pallas import tpu as pltpu

EMBED_DIM = 64
HIDDEN_DIM = 128
OUTPUT_DIM = 5
DROPOUT_RATE = 0.1  # inference: dropout is identity

MAX_BATCH_TILE = 256   # Bt*S = 2048 M-rows per step; ~10 MB live VMEM at f32
LANE = 128             # TPU lane width; output padded to this for dense stores


def _attn_classifier_kernel(x_ref, wqkv_ref, bqkv_ref, wc_ref, bc_ref, out_ref):
    # x_ref    : (Bt, S, E) f32   batch tile
    # wqkv_ref : (E, 3H)    bf16  fused QKV weight (1/sqrt(H) folded into Q cols)
    # bqkv_ref : (1, 3H)    f32
    # wc_ref   : (H, O_pad) bf16  classifier weight * (1/S), zero-padded to 128
    # bc_ref   : (1, O_pad) f32
    # out_ref  : (Bt, O_pad) f32  lane-dense logits block
    Bt, S, E = x_ref.shape
    H = wc_ref.shape[0]

    # Fused QKV projection: one (Bt*S, E) @ (E, 3H) bf16 MXU matmul with f32
    # accumulation.  Merging the two leading dims is a free relayout (lane
    # layout of the last dim is untouched), so this stays a single big matmul.
    x2d = x_ref[...].astype(jnp.bfloat16).reshape(Bt * S, E)
    qkv = jnp.dot(x2d, wqkv_ref[...], preferred_element_type=jnp.float32)
    qkv = qkv + bqkv_ref[...]                                    # (Bt*S, 3H) f32

    # 128-aligned lane slices; splitting the leading dim back out is free.
    q = qkv[:, 0 * H:1 * H].reshape(Bt, S, H)   # already scaled by 1/sqrt(H)
    k = qkv[:, 1 * H:2 * H].reshape(Bt, S, H)
    v = qkv[:, 2 * H:3 * H].reshape(Bt, S, H)

    # Batched attention scores; contract the last dims directly (no explicit
    # .T / XLU transpose).  bf16 MXU inputs, f32 accumulation.
    scores = jnp.einsum("bsd,btd->bst",
                        q.astype(jnp.bfloat16), k.astype(jnp.bfloat16),
                        preferred_element_type=jnp.float32)      # (Bt, S, S)

    # Numerically stable softmax over the key axis (matches F.softmax), f32.
    m = jnp.max(scores, axis=-1, keepdims=True)
    e = jnp.exp(scores - m)
    denom = jnp.sum(e, axis=-1, keepdims=True)                   # >= 1
    attn = e * pl.reciprocal(denom, approx=True)

    # mean_s(attn @ V) == (sum_s attn) @ V * (1/S): collapse the batched
    # attn@V matmuls and the mean-pool into a broadcast-multiply + reduce.
    # The 1/S factor is folded into wc in the wrapper.
    abar = jnp.sum(attn, axis=1)                                 # (Bt, S)
    pooled = jnp.sum(abar[:, :, None] * v, axis=1)               # (Bt, H)

    # TODO(synk): nn.Dropout is identity at inference; train-mode masking not implemented.
    logits = jnp.dot(pooled.astype(jnp.bfloat16), wc_ref[...],
                     preferred_element_type=jnp.float32) + bc_ref[...]  # (Bt, O_pad)
    out_ref[...] = logits.astype(out_ref.dtype)


def self_attention_classifier(x, params, max_batch_tile=MAX_BATCH_TILE):
    """x: (B, S, E) float32 -> logits (B, OUTPUT_DIM) float32."""
    B, S, E = x.shape
    wq, bq, wk, bk, wv, bv, wc, bc = params
    H = wq.shape[1]
    O = wc.shape[1]

    # One-time parameter transforms (tiny, f32 math then bf16 cast):
    #   * fold 1/sqrt(H) into the Q projection (weight AND bias),
    #   * fuse Q|K|V into one (E, 3H) weight,
    #   * fold the 1/S mean-pool factor into the classifier weight,
    #   * zero-pad the classifier to a lane-dense 128-wide output block.
    scale = 1.0 / jnp.sqrt(jnp.float32(H))
    wqkv = jnp.concatenate([wq * scale, wk, wv], axis=1).astype(jnp.bfloat16)
    bqkv = jnp.concatenate([bq * scale, bk, bv], axis=1)          # (1, 3H) f32
    o_pad = max(LANE, pl.cdiv(O, LANE) * LANE)
    wc_p = jnp.zeros((H, o_pad), jnp.float32).at[:, :O].set(wc / jnp.float32(S))
    wc_p = wc_p.astype(jnp.bfloat16)
    bc_p = jnp.zeros((1, o_pad), jnp.float32).at[:, :O].set(bc)

    # Batch tile: no host-side padding of x (the ragged tail block is partial;
    # its garbage rows are batch-independent and sliced off below).  Keep
    # grid >= 2 when B > 8 so both v7x TensorCores get work; keep bt a
    # multiple of 8 so the (bt, o_pad) output block satisfies sublane tiling.
    bt = min(B, max_batch_tile)
    if B > 8:
        bt = min(bt, ((pl.cdiv(B, 2) + 7) // 8) * 8)
    grid = pl.cdiv(B, bt)

    out = pl.pallas_call(
        _attn_classifier_kernel,
        out_shape=jax.ShapeDtypeStruct((B, o_pad), jnp.float32),
        grid_spec=pltpu.PrefetchScalarGridSpec(
            num_scalar_prefetch=0,
            grid=(grid,),
            in_specs=[
                pl.BlockSpec((bt, S, E), lambda b: (b, 0, 0)),    # x batch tile
                pl.BlockSpec((E, 3 * H), lambda b: (0, 0)),       # fused Wqkv
                pl.BlockSpec((1, 3 * H), lambda b: (0, 0)),       # fused bqkv
                pl.BlockSpec((H, o_pad), lambda b: (0, 0)),       # Wc (padded, /S)
                pl.BlockSpec((1, o_pad), lambda b: (0, 0)),       # bc (padded)
            ],
            out_specs=pl.BlockSpec((bt, o_pad), lambda b: (b, 0)),
        ),
        compiler_params=pltpu.CompilerParams(
            dimension_semantics=("parallel",),
            vmem_limit_bytes=32 * 1024 * 1024),
    )(x, wqkv, bqkv, wc_p, bc_p)
    return out[:B, :O]


def init_params(key, embedding_dim=EMBED_DIM, hidden_dim=HIDDEN_DIM,
                output_dim=OUTPUT_DIM):
    """Deterministic init mimicking nn.Linear (uniform +-1/sqrt(fan_in)).
    Weights are stored as (in, out)."""
    ks = jax.random.split(key, 8)

    def linear(kw, kb, fan_in, fan_out):
        bound = 1.0 / jnp.sqrt(jnp.float32(fan_in))
        w = jax.random.uniform(kw, (fan_in, fan_out), jnp.float32, -bound, bound)
        b = jax.random.uniform(kb, (1, fan_out), jnp.float32, -bound, bound)
        return w, b

    wq, bq = linear(ks[0], ks[1], embedding_dim, hidden_dim)
    wk, bk = linear(ks[2], ks[3], embedding_dim, hidden_dim)
    wv, bv = linear(ks[4], ks[5], embedding_dim, hidden_dim)
    wc, bc = linear(ks[6], ks[7], hidden_dim, output_dim)
    return (wq, bq, wk, bk, wv, bv, wc, bc)


def _reference(x, params):
    """Pure-JAX f32 reference of the PyTorch forward (eval mode)."""
    wq, bq, wk, bk, wv, bv, wc, bc = params
    q = x @ wq + bq
    k = x @ wk + bk
    v = x @ wv + bv
    scores = jnp.einsum("bsh,bth->bst", q, k) / jnp.sqrt(jnp.float32(q.shape[-1]))
    attn = jax.nn.softmax(scores, axis=-1)
    hidden = jnp.einsum("bst,bth->bsh", attn, v)
    pooled = hidden.mean(axis=1)
    return pooled @ wc + bc


if __name__ == "__main__":
    key = jax.random.PRNGKey(0)
    kx, kp, kx2 = jax.random.split(key, 3)

    params = init_params(kp)

    # bf16 MXU path vs f32 reference -> relaxed tolerance.
    TOL = 3e-2

    # Spec-consistent small case: batch=2, seq=8, embed=64 (single grid step).
    batch, seq = 2, 8
    x = jax.random.normal(kx, (batch, seq, EMBED_DIM), dtype=jnp.float32)
    logits = jax.block_until_ready(self_attention_classifier(x, params))
    ref = _reference(x, params)
    assert logits.shape == (batch, OUTPUT_DIM)
    assert jnp.allclose(logits, ref, atol=TOL, rtol=TOL)

    # Multi-step grid + ragged (partial) tail block, no host-side padding.
    batch2 = 130
    x2 = jax.random.normal(kx2, (batch2, seq, EMBED_DIM), dtype=jnp.float32)
    logits2 = jax.block_until_ready(self_attention_classifier(x2, params))
    ref2 = _reference(x2, params)
    assert logits2.shape == (batch2, OUTPUT_DIM)
    assert jnp.allclose(logits2, ref2, atol=TOL, rtol=TOL)

    print("KERNEL_OK")
</pallas_src>

<mosaic_0001>
module attributes {stable_mosaic.version = 11 : i64} {
  func.func @_attn_classifier_kernel(%arg0: i32, %arg1: memref<2x8x64xf32, #tpu.memory_space<vmem>>, %arg2: memref<64x384xbf16, #tpu.memory_space<vmem>>, %arg3: memref<1x384xf32, #tpu.memory_space<vmem>>, %arg4: memref<128x128xbf16, #tpu.memory_space<vmem>>, %arg5: memref<1x128xf32, #tpu.memory_space<vmem>>, %arg6: memref<2x128xf32, #tpu.memory_space<vmem>>) attributes {dimension_semantics = [#tpu.dimension_semantics<parallel>], iteration_bounds = array<i64: 1>, scalar_prefetch = 0 : i64, scratch_operands = 0 : i64, tpu.core_type = #tpu.core_type<tc>, window_params = [{transform_indices = @transform_0, window_bounds = array<i64: 2, 8, 64>}, {pipeline_mode = #tpu.pipeline_mode<synchronous>, transform_indices = @transform_1, window_bounds = array<i64: 64, 384>}, {pipeline_mode = #tpu.pipeline_mode<synchronous>, transform_indices = @transform_2, window_bounds = array<i64: 1, 384>}, {pipeline_mode = #tpu.pipeline_mode<synchronous>, transform_indices = @transform_3, window_bounds = array<i64: 128, 128>}, {pipeline_mode = #tpu.pipeline_mode<synchronous>, transform_indices = @transform_4, window_bounds = array<i64: 1, 128>}, {transform_indices = @transform_5, window_bounds = array<i64: 2, 128>}]} {
    %c0 = arith.constant 0 : index
    %c0_0 = arith.constant 0 : index
    %c0_1 = arith.constant 0 : index
    %0 = vector.load %arg1[%c0, %c0_0, %c0_1] : memref<2x8x64xf32, #tpu.memory_space<vmem>>, vector<2x8x64xf32>
    %1 = arith.truncf %0 : vector<2x8x64xf32> to vector<2x8x64xbf16>
    %2 = vector.shape_cast %1 : vector<2x8x64xbf16> to vector<16x64xbf16>
    %c0_2 = arith.constant 0 : index
    %c0_3 = arith.constant 0 : index
    %3 = vector.load %arg2[%c0_2, %c0_3] : memref<64x384xbf16, #tpu.memory_space<vmem>>, vector<64x384xbf16>
    %cst = arith.constant dense<0.000000e+00> : vector<16x384xf32>
    %4 = tpu.matmul %2, %3, %cst {dimension_numbers = #tpu.dot_dimension_numbers<[1], [0], [0], [1], [0, 0, 1, 1], [], []>} : vector<16x64xbf16>, vector<64x384xbf16>, vector<16x384xf32> -> vector<16x384xf32>
    %c0_4 = arith.constant 0 : index
    %c0_5 = arith.constant 0 : index
    %5 = vector.load %arg3[%c0_4, %c0_5] : memref<1x384xf32, #tpu.memory_space<vmem>>, vector<1x384xf32>
    %6 = vector.broadcast %5 : vector<1x384xf32> to vector<16x384xf32>
    %7 = arith.addf %4, %6 : vector<16x384xf32>
    %8 = vector.extract_strided_slice %7 {offsets = [0, 0], sizes = [16, 128], strides = [1, 1]} : vector<16x384xf32> to vector<16x128xf32>
    %9 = vector.shape_cast %8 : vector<16x128xf32> to vector<2x8x128xf32>
    %10 = vector.extract_strided_slice %7 {offsets = [0, 128], sizes = [16, 128], strides = [1, 1]} : vector<16x384xf32> to vector<16x128xf32>
    %11 = vector.shape_cast %10 : vector<16x128xf32> to vector<2x8x128xf32>
    %12 = vector.extract_strided_slice %7 {offsets = [0, 256], sizes = [16, 128], strides = [1, 1]} : vector<16x384xf32> to vector<16x128xf32>
    %13 = vector.shape_cast %12 : vector<16x128xf32> to vector<2x8x128xf32>
    %14 = arith.truncf %9 : vector<2x8x128xf32> to vector<2x8x128xbf16>
    %15 = arith.truncf %11 : vector<2x8x128xf32> to vector<2x8x128xbf16>
    "tpu.trace_start"() <{level = 10 : i32, message = "bsd,btd->bst"}> : () -> ()
    %cst_6 = arith.constant dense<0.000000e+00> : vector<2x8x8xf32>
    %16 = tpu.matmul %14, %15, %cst_6 {dimension_numbers = #tpu.dot_dimension_numbers<[2], [2], [1], [1], [0, 0, 0, 1, 1, 1], [0], [0]>} : vector<2x8x128xbf16>, vector<2x8x128xbf16>, vector<2x8x8xf32> -> vector<2x8x8xf32>
    "tpu.trace_stop"() : () -> ()
    %cst_7 = arith.constant dense<0xFF800000> : vector<2x8xf32>
    %17 = vector.multi_reduction <maximumf>, %16, %cst_7 [2] : vector<2x8x8xf32> to vector<2x8xf32>
    %18 = vector.shape_cast %17 : vector<2x8xf32> to vector<2x8x1xf32>
    %19 = vector.broadcast %18 : vector<2x8x1xf32> to vector<2x8x8xf32>
    %20 = arith.subf %16, %19 : vector<2x8x8xf32>
    %21 = math.exp %20 : vector<2x8x8xf32>
    %cst_8 = arith.constant dense<0.000000e+00> : vector<2x8xf32>
    %22 = vector.multi_reduction <add>, %21, %cst_8 [2] : vector<2x8x8xf32> to vector<2x8xf32>
    %23 = vector.shape_cast %22 : vector<2x8xf32> to vector<2x8x1xf32>
    %24 = tpu.reciprocal %23 {approx = true} : vector<2x8x1xf32> -> vector<2x8x1xf32>
    %25 = vector.broadcast %24 : vector<2x8x1xf32> to vector<2x8x8xf32>
    %26 = arith.mulf %21, %25 : vector<2x8x8xf32>
    %cst_9 = arith.constant dense<0.000000e+00> : vector<2x8xf32>
    %27 = vector.multi_reduction <add>, %26, %cst_9 [1] : vector<2x8x8xf32> to vector<2x8xf32>
    %28 = vector.shape_cast %27 : vector<2x8xf32> to vector<2x8x1xf32>
    %29 = vector.broadcast %28 : vector<2x8x1xf32> to vector<2x8x128xf32>
    %30 = arith.mulf %29, %13 : vector<2x8x128xf32>
    %cst_10 = arith.constant dense<0.000000e+00> : vector<2x128xf32>
    %31 = vector.multi_reduction <add>, %30, %cst_10 [1] : vector<2x8x128xf32> to vector<2x128xf32>
    %32 = arith.truncf %31 : vector<2x128xf32> to vector<2x128xbf16>
    %c0_11 = arith.constant 0 : index
    %c0_12 = arith.constant 0 : index
    %33 = vector.load %arg4[%c0_11, %c0_12] : memref<128x128xbf16, #tpu.memory_space<vmem>>, vector<128x128xbf16>
    %cst_13 = arith.constant dense<0.000000e+00> : vector<2x128xf32>
    %34 = tpu.matmul %32, %33, %cst_13 {dimension_numbers = #tpu.dot_dimension_numbers<[1], [0], [0], [1], [0, 0, 1, 1], [], []>} : vector<2x128xbf16>, vector<128x128xbf16>, vector<2x128xf32> -> vector<2x128xf32>
    %c0_14 = arith.constant 0 : index
    %c0_15 = arith.constant 0 : index
    %35 = vector.load %arg5[%c0_14, %c0_15] : memref<1x128xf32, #tpu.memory_space<vmem>>, vector<1x128xf32>
    %36 = vector.broadcast %35 : vector<1x128xf32> to vector<2x128xf32>
    %37 = arith.addf %34, %36 : vector<2x128xf32>
    %c0_16 = arith.constant 0 : index
    %c0_17 = arith.constant 0 : index
    %38 = vector.load %arg6[%c0_16, %c0_17] : memref<2x128xf32, #tpu.memory_space<vmem>>, vector<2x128xf32>
    tpu.vector_store %arg6[%c0_16, %c0_17], %37 {strides = array<i32>} : memref<2x128xf32, #tpu.memory_space<vmem>>, vector<2x128xf32>,
    return
  }
  func.func @transform_0(%arg0: i32) -> (i32, i32, i32) {
    %c0_i32 = arith.constant 0 : i32
    %c0_i32_0 = arith.constant 0 : i32
    %c0_i32_1 = arith.constant 0 : i32
    return %arg0, %c0_i32, %c0_i32_0 : i32, i32, i32
  }
  func.func @transform_1(%arg0: i32) -> (i32, i32) {
    %c0_i32 = arith.constant 0 : i32
    %c0_i32_0 = arith.constant 0 : i32
    %c0_i32_1 = arith.constant 0 : i32
    return %c0_i32, %c0_i32_0 : i32, i32
  }
  func.func @transform_2(%arg0: i32) -> (i32, i32) {
    %c0_i32 = arith.constant 0 : i32
    %c0_i32_0 = arith.constant 0 : i32
    %c0_i32_1 = arith.constant 0 : i32
    return %c0_i32, %c0_i32_0 : i32, i32
  }
  func.func @transform_3(%arg0: i32) -> (i32, i32) {
    %c0_i32 = arith.constant 0 : i32
    %c0_i32_0 = arith.constant 0 : i32
    %c0_i32_1 = arith.constant 0 : i32
    return %c0_i32, %c0_i32_0 : i32, i32
  }
  func.func @transform_4(%arg0: i32) -> (i32, i32) {
    %c0_i32 = arith.constant 0 : i32
    %c0_i32_0 = arith.constant 0 : i32
    %c0_i32_1 = arith.constant 0 : i32
    return %c0_i32, %c0_i32_0 : i32, i32
  }
  func.func @transform_5(%arg0: i32) -> (i32, i32) {
    %c0_i32 = arith.constant 0 : i32
    %c0_i32_0 = arith.constant 0 : i32
    return %arg0, %c0_i32 : i32, i32
  }
}

</mosaic_0001>

<bundles_post_ra>
// kernel: tpu_custom_call.1
= control target key start
LH: loop header
LB: loop body
LE: loop exit
PB: predicated region body
PF: predicated region fallthrough
CT: control target
= control target key end

     0   :  { %10 = vsyncpa [#allocation3], 0  ;;  %s761_s0 = inlined_call_operand.hbm [shape: f32[2,8,64], index: 0, kind: input, shape index: {}]   ;;  %s762_s1 = inlined_call_operand.hbm [shape: bf16[64,384], index: 1, kind: input, shape index: {}]   ;;  %s763_s2 = inlined_call_operand.hbm [shape: f32[1,384], index: 2, kind: input, shape index: {}]   ;;  %s764_s3 = inlined_call_operand.hbm [shape: bf16[128,128], index: 3, kind: input, shape index: {}]   ;;  %s765_s4 = inlined_call_operand.vmem [shape: f32[1,128], index: 4, kind: input, shape index: {}]   ;;  %s766_s5 = inlined_call_operand.hbm [shape: f32[2,128], index: 5, kind: output, shape index: {}]  }
   0x1   :  { %11 = vsyncpa [#allocation6], 0 }
   0x2   :  { %12 = vsyncpa [#allocation9], 0  ;;  %s31_s20 = sshll.u32 %s762_s1, 4  ;;  %s32_s20 = int_to_ptr.hbm [resolvable:$true] %s31_s20 }
   0x3   :  { %13 = vsyncpa [#allocation4], 0  ;;  %s683_s21 = smov [#allocation5]   ;;  %s18_s25 = sshll.u32 %s761_s0, 4  ;;  %s19_s25 = int_to_ptr.hbm [resolvable:$true] %s18_s25 }
   0x4   :  { %s33_s22 = sshll.u32 %s683_s21, 4  ;;  %s684_s26 = smov 192   ;;  %s34_s22 = int_to_ptr.vmem [resolvable:$true] %s33_s22 }
   0x5   :  { %s685_s27 = smov 12   ;;  %s686_s28 = smov [#allocation2]  }
   0x6   :  { %39 = dma.hbm_to_vmem [thread:$0]  %s32_s20, 1536, %s34_s22, [#allocation6], %s684_s26, %s684_s26, %s685_s27  }
   0x7   :  { %s20_s29 = sshll.u32 %s686_s28, 4  ;;  %s687_s30 = smov 128   ;;  %s21_s29 = int_to_ptr.vmem [resolvable:$true] %s20_s29 }
   0x8   :  { %s688_s6 = smov 8   ;;  %s45_s8 = sshll.u32 %s763_s2, 4  ;;  %s46_s8 = int_to_ptr.hbm [resolvable:$true] %s45_s8 }
   0x9   :  { %26 = dma.hbm_to_vmem [thread:$0]  %s19_s25, 256, %s21_s29, [#allocation3], %s687_s30, %s687_s30, %s688_s6  }
   0xa   :  { %s689_s9 = smov [#allocation7]   ;;  %s55_s12 = sshll.u32 %s764_s3, 4  ;;  %s56_s12 = int_to_ptr.hbm [resolvable:$true] %s55_s12 }
   0xb   :  { %s47_s10 = sshll.u32 %s689_s9, 4  ;;  %s690_s13 = smov [#allocation8]   ;;  %s48_s10 = int_to_ptr.vmem [resolvable:$true] %s47_s10 }
   0xc   :  { %50 = dma.hbm_to_vmem [thread:$0]  %s46_s8, 48, %s48_s10, [#allocation6]  }
   0xd   :  { %s57_s14 = sshll.u32 %s690_s13, 4  ;;  %s691_s15 = smov 64   ;;  %s58_s14 = int_to_ptr.vmem [resolvable:$true] %s57_s14 }
   0xe   :  { %s692_s16 = smov 4  }
   0xf   :  { %63 = dma.hbm_to_vmem [thread:$0]  %s56_s12, 1024, %s58_s14, [#allocation9], %s691_s15, %s691_s15, %s692_s16  }
  0x10   :  { %675 = dma.done.wait [#allocation3], 256  }
  0x11   :  { %676 = vsyncadd [#allocation3], 4294967040 }
  0x12   :  { %677 = dma.done.wait [#allocation6], 1584  }
  0x13   :  { %678 = vsyncadd [#allocation6], 4294965712 }
  0x14   :  { %679 = dma.done.wait [#allocation9], 1024  }
  0x15   :  { %680 = vsyncadd [#allocation9], 4294966272  ;;  %v468_v0 = vld [vmem:[#allocation5 + $0x48] sm:$0xf]  ;;  %v523_v1 = vld [vmem:[#allocation5 + $0x50] sm:$0xf0] }
  0x16   :  { %v456_v2 = vld [vmem:[#allocation5 + $0x30] sm:$0xf]  ;;  %v469_v3 = vor.u32 %v523_v1, %v468_v0  ;;  %v520_v4 = vld [vmem:[#allocation5 + $0x38] sm:$0xf0]  ;;  %v444_v8 = vld [vmem:[#allocation5 + $0x18] sm:$0xf] }
  0x17   :  { %v457_v5 = vor.u32 %v520_v4, %v456_v2  ;;  %v83_v6 = vld [vmem:[#allocation2] sm:$0xff]  ;;  %v84_v7 = vld [vmem:[#allocation2 + $0x8] sm:$0xff]  ;;  %v517_v9 = vld [vmem:[#allocation5 + $0x20] sm:$0xf0]  ;;  %vm180_vm0 = vcmask 523264   ;;  %vm256_vm1 = vcmask 64512  }
  0x18   :  { %188 = vmatpush.bf16.msra.mxu1 %v469_v3  ;;  %v85_v10 = vpack.c.bf16 %v83_v6, %v83_v6  ;;  %v86_v11 = vpack.c.bf16 %v84_v7, %v84_v7  ;;  %v445_v12 = vor.u32 %v517_v9, %v444_v8  ;;  %v432_v13 = vld [vmem:[#allocation5] sm:$0xf]  ;;  %v514_v14 = vld [vmem:[#allocation5 + $0x8] sm:$0xf0]  ;;  %v470_v16 = vld [vmem:[#allocation5 + $0x54] sm:$0xf0] }
  0x19   :  { %v522_v15 = vld [vmem:[#allocation5 + $0x4c] sm:$0xf]  ;;  %v433_v19 = vor.u32 %v514_v14, %v432_v13  ;;  %v519_v21 = vld [vmem:[#allocation5 + $0x34] sm:$0xf]  ;;  %v458_v22 = vld [vmem:[#allocation5 + $0x3c] sm:$0xf0] }
  0x1a   :  { %v113_v17 = vunpack.c.l.b16 %v85_v10  ;;  %v114_v18 = vunpack.c.l.b16 %v86_v11  ;;  %v473_v20 = vor.u32 %v522_v15, %v470_v16  ;;  %v461_v24 = vor.u32 %v519_v21, %v458_v22  ;;  %v516_v25 = vld [vmem:[#allocation5 + $0x1c] sm:$0xf]  ;;  %v446_v26 = vld [vmem:[#allocation5 + $0x24] sm:$0xf0]  ;;  %v513_v28 = vld [vmem:[#allocation5 + $0x4] sm:$0xf] }
  0x1b   :  { %v449_v27 = vor.u32 %v516_v25, %v446_v26  ;;  %v434_v29 = vld [vmem:[#allocation5 + $0xc] sm:$0xf0]  ;;  %v742_v33 = vld [vmem:[#allocation7] sm:$0x7]  ;;  %v524_v53 = vld [vmem:[#allocation5 + $0x58] sm:$0xf0]  ;;  %v293_v10 = vlaneseq }
  0x1c   :  { %189 = vmatpush.bf16.msra.mxu1 %v457_v5  ;;  %v736_v23 = vpack.c.b16 %v114_v18, %v113_v17  ;;  %v437_v30 = vor.u32 %v513_v28, %v434_v29  ;;  %v106_v34 = vperm.slane %v742_v33, 1  ;;  %v105_v37 = vperm.slane %v742_v33, 0  ;;  %v476_v52 = vld [vmem:[#allocation5 + $0x50] sm:$0xf]  ;;  %v464_v54 = vld [vmem:[#allocation5 + $0x38] sm:$0xf] }
  0x1d   :  { %v477_v55 = vor.u32 %v524_v53, %v476_v52  ;;  %v521_v56 = vld [vmem:[#allocation5 + $0x40] sm:$0xf0]  ;;  %v452_v60 = vld [vmem:[#allocation5 + $0x20] sm:$0xf]  ;;  %v518_v61 = vld [vmem:[#allocation5 + $0x28] sm:$0xf0] }
  0x1e   :  { %v465_v58 = vor.u32 %v521_v56, %v464_v54  ;;  %v453_v63 = vor.u32 %v518_v61, %v452_v60  ;;  %v440_v0 = vld [vmem:[#allocation5 + $0x8] sm:$0xf]  ;;  %v515_v1 = vld [vmem:[#allocation5 + $0x10] sm:$0xf0]  ;;  %v294_v11 = vshrl.u32 %v293_v10, 7  ;;  %vm345_vm2 = vcmask 1041409  }
  0x1f   :  { %216 = vmatpush.bf16.msra.mxu2 %v477_v55  ;;  %v441_v2 = vor.u32 %v515_v1, %v440_v0  ;;  %s693_s17 = smov [#allocation10]   ;;  %s418_s21 = sshll.u32 %s766_s5, 4  ;;  %s419_s21 = int_to_ptr.hbm [resolvable:$true] %s418_s21 }
  0x20   :  { %190 = vmatpush.bf16.msra.mxu1 %v445_v12  ;;  %544 = vset.pattern.permute.xlu2 %v294_v11  ;;  %s416_s18 = sshll.u32 %s693_s17, 4  ;;  %s417_s18 = int_to_ptr.vmem [resolvable:$true] %s416_s18 }
  0x21   :  { %545 = vset.pattern.permute.xlu0 %v294_v11 }
  0x23   :  { %217 = vmatpush.bf16.msra.mxu2 %v465_v58 }
  0x24   :  { %191 = vmatpush.bf16.msra.mxu1 %v433_v19 }
  0x27   :  { %478 = vmatmul.msk.bf16.vlgmr.msra.gmra.mxu1 %vm180_vm0, %v736_v23  ;;  %218 = vmatpush.bf16.msra.mxu2 %v453_v63 }
  0x28   :  { %202 = vmatpush.bf16.msrb.mxu1 %v473_v20 }
  0x2b   :  { %219 = vmatpush.bf16.msra.mxu2 %v441_v2 }
  0x2c   :  { %203 = vmatpush.bf16.msrb.mxu1 %v461_v24 }
  0x2e   :  { %480 = vmatmul.msk.bf16.vlgmr.msra.gmra.mxu2 %vm180_vm0, %v736_v23 }
  0x30   :  { %204 = vmatpush.bf16.msrb.mxu1 %v449_v27 }
  0x34   :  { %205 = vmatpush.bf16.msrb.mxu1 %v437_v30 }
  0x37   :  { %479 = vmatmul.msk.bf16.vlgmr.msrb.gmra.mxu1 %vm180_vm0, %v736_v23 }
  0xa4   :  { %v193_v31 = vpop.f32.mrf.mxu1 }
  0xa5   :  { %v194_v39 = vadd.f32 %v193_v31, %v105_v37 }
  0xa7   :  { %v226_v42 = vpack.c.bf16 %v194_v39, %v194_v39  ;;  %v527_v39 = vld [vmem:[#allocation8 + $0x10] sm:$0xff] }
  0xac   :  { %v195_v32 = vpop.f32.mrf.mxu1 }
  0xad   :  { %v196_v44 = vadd.f32 %v195_v32, %v105_v37  ;;  %v532_v32 = vld [vmem:[#allocation8 + $0x38] sm:$0xff] }
  0xae   :  { %397 = vmatpush.bf16.msra.mxu0 %v532_v32  ;;  %v528_v37 = vld [vmem:[#allocation8 + $0x18] sm:$0xff] }
  0xaf   :  { %v227_v45 = vpack.c.bf16 %v196_v44, %v196_v44 }
  0xb4   :  { %v207_v35 = vpop.f32.mrf.mxu1 }
  0xb5   :  { %v208_v36 = vadd.f32 %v207_v35, %v106_v34  ;;  %v530_v35 = vld [vmem:[#allocation8 + $0x28] sm:$0xff] }
  0xb7   :  { %v228_v38 = vpack.c.bf16 %v208_v36, %v208_v36  ;;  %v529_v36 = vld [vmem:[#allocation8 + $0x20] sm:$0xff] }
  0xb9   :  { %237 = vmatpush.bf16.xpose.msra.mxu3 %v228_v38  ;;  %v107_v38 = vperm.slane %v742_v33, 2 }
  0xbc   :  { %v209_v40 = vpop.f32.mrf.mxu1 }
  0xbd   :  { %v210_v41 = vadd.f32 %v209_v40, %v106_v34  ;;  %v531_v34 = vld [vmem:[#allocation8 + $0x30] sm:$0xff]  ;;  %v221_v40 = vpop.f32.mrf.mxu2 }
  0xbe   :  { %398 = vmatpush.bf16.msra.mxu0 %v531_v34 }
  0xbf   :  { %v229_v43 = vpack.c.bf16 %v210_v41, %v210_v41  ;;  %v222_v41 = vadd.f32 %v221_v40, %v107_v38 }
  0xc0   :  { %238 = vmatmul.bf16.vlgmr.msra.gmra.mxu3 %v226_v42  ;;  %v526_v42 = vld [vmem:[#allocation8 + $0x8] sm:$0xff] }
  0xc1   :  { %250 = vmatpush.bf16.xpose.msrb.mxu3 %v229_v43  ;;  %v525_v43 = vld [vmem:[#allocation8] sm:$0xff] }
  0xc2   :  { %399 = vmatpush.bf16.msra.mxu0 %v530_v35 }
  0xc6   :  { %400 = vmatpush.bf16.msra.mxu0 %v529_v36 }
  0xca   :  { %401 = vmatpush.bf16.msra.mxu0 %v528_v37 }
  0xce   :  { %402 = vmatpush.bf16.msra.mxu0 %v527_v39 }
  0xd0   :  { %251 = vmatmul.bf16.vlgmr.msrb.gmra.mxu3 %v227_v45 }
  0xd2   :  { %403 = vmatpush.bf16.msra.mxu0 %v526_v42 }
  0xd6   :  { %404 = vmatpush.bf16.msra.mxu0 %v525_v43 }
 0x143   :  { %v239_v46 = vpop.f32.mrf.mxu3 }
 0x144   :  { %v257_v47 = vsel %vm256_vm1, %v239_v46, -inf }
 0x145   :  { %258 = vmax.xlane.f32.xlu0 %v257_v47 }
 0x14b   :  { %v241_v48 = vpop.f32.mrf.mxu3 }
 0x14c   :  { %v223_v48 = vpop.f32.mrf.mxu2 }
 0x153   :  { %v252_v49 = vpop.f32.mrf.mxu3 }
 0x154   :  { %v260_v50 = vsel %vm256_vm1, %v252_v49, -inf }
 0x155   :  { %261 = vmax.xlane.f32.xlu0 %v260_v50  ;;  %v224_v50 = vadd.f32 %v223_v48, %v107_v38 }
 0x15b   :  { %v254_v51 = vpop.f32.mrf.mxu3 }
 0x1b8   :  { %v259_v57 = vpop.xlane.xlu0 %258 }
 0x1b9   :  { %v263_v59 = vsub.f32 %v239_v46, %v259_v57 }
 0x1bb   :  { %v265_v62 = vmul.f32 1.442695, %v263_v59 }
 0x1bd   :  { %547 = vpow2.f32 %v265_v62 }
 0x1c3   :  { %v548_v3 = vpop.eup %547 }
 0x1c4   :  { %v269_v4 = vsel %vm256_vm1, %v548_v3, 0.0 }
 0x1c5   :  { %270 = vadd.xlane.f32.xlu1 %v269_v4 }
 0x1c8   :  { %v262_v5 = vpop.xlane.xlu0 %261 }
 0x1c9   :  { %v264_v6 = vsub.f32 %v252_v49, %v262_v5 }
 0x1cb   :  { %v267_v7 = vmul.f32 1.442695, %v264_v6 }
 0x1cd   :  { %549 = vpow2.f32 %v267_v7 }
 0x1d3   :  { %v550_v8 = vpop.eup %549 }
 0x1d4   :  { %v272_v9 = vsel %vm256_vm1, %v550_v8, 0.0 }
 0x1d5   :  { %273 = vadd.xlane.f32.xlu1 %v272_v9 }
 0x238   :  { %v271_v12 = vpop.xlane.xlu1 %270 }
 0x239   :  { %551 = vrcp.f32 %v271_v12 }
 0x23f   :  { %v552_v13 = vpop.eup %551 }
 0x240   :  { %v277_v14 = vmul.f32 %v552_v13, %v548_v3  ;;  %v546_v3 = vld [vmem:[%s765_s4] ss:$0 sm:$0xff] }
 0x242   :  { %v279_v15 = vsel %vm256_vm1, %v277_v14, 0.0 }
 0x243   :  { %v280_v16 = vrot.slane %v279_v15, 4 }
 0x245   :  { %v281_v17 = vadd.f32 %v280_v16, %v279_v15 }
 0x247   :  { %v282_v18 = vrot.slane %v281_v17, 2 }
 0x248   :  { %v274_v19 = vpop.xlane.xlu1 %273 }
 0x249   :  { %553 = vrcp.f32 %v274_v19  ;;  %v283_v20 = vadd.f32 %v282_v18, %v281_v17 }
 0x24b   :  { %v284_v21 = vrot.slane %v283_v20, 1 }
 0x24d   :  { %v285_v22 = vadd.f32 %v284_v21, %v283_v20 }
 0x24f   :  { %v554_v23 = vpop.eup %553  ;;  %297 = vperm.xlu2 %544, %v285_v22  }
 0x250   :  { %v278_v24 = vmul.f32 %v554_v23, %v550_v8 }
 0x252   :  { %v286_v25 = vsel %vm256_vm1, %v278_v24, 0.0 }
 0x253   :  { %v287_v26 = vrot.slane %v286_v25, 4 }
 0x255   :  { %v288_v27 = vadd.f32 %v287_v26, %v286_v25 }
 0x257   :  { %v289_v28 = vrot.slane %v288_v27, 2 }
 0x259   :  { %v290_v29 = vadd.f32 %v289_v28, %v288_v27 }
 0x25b   :  { %v291_v30 = vrot.slane %v290_v29, 1 }
 0x25d   :  { %v292_v31 = vadd.f32 %v291_v30, %v290_v29 }
 0x25f   :  { %303 = vperm.xlu2 %544, %v292_v31  }
 0x2a9   :  { %v298_v44 = vpop.permute.xlu2 %297 }
 0x2aa   :  { %v305_v45 = vmul.f32 %v298_v44, %v222_v41 }
 0x2ac   :  { %v307_v46 = vrot.slane %v305_v45, 4 }
 0x2ae   :  { %v308_v47 = vadd.f32 %v307_v46, %v305_v45 }
 0x2b0   :  { %v309_v49 = vrot.slane %v308_v47, 2 }
 0x2b2   :  { %v310_v52 = vadd.f32 %v309_v49, %v308_v47 }
 0x2b4   :  { %v311_v33 = vrot.slane %v310_v52, 1 }
 0x2b6   :  { %v312_v57 = vadd.f32 %v311_v33, %v310_v52 }
 0x2b8   :  { %v319_v61 = vpack.c.bf16 %v312_v57, %v312_v57 }
 0x2b9   :  { %v304_v51 = vpop.permute.xlu2 %303 }
 0x2ba   :  { %v306_v53 = vmul.f32 %v304_v51, %v224_v50  ;;  %v343_v63 = vunpack.c.l.b16 %v319_v61 }
 0x2bc   :  { %v313_v54 = vrot.slane %v306_v53, 4 }
 0x2be   :  { %v314_v55 = vadd.f32 %v313_v54, %v306_v53 }
 0x2c0   :  { %v315_v56 = vrot.slane %v314_v55, 2 }
 0x2c2   :  { %v316_v58 = vadd.f32 %v315_v56, %v314_v55 }
 0x2c4   :  { %v317_v59 = vrot.slane %v316_v58, 1 }
 0x2c6   :  { %v318_v60 = vadd.f32 %v317_v59, %v316_v58 }
 0x2c8   :  { %v320_v62 = vpack.c.bf16 %v318_v60, %v318_v60 }
 0x2ca   :  { %v344_v0 = vunpack.c.l.b16 %v320_v62 }
 0x2cc   :  { %v346_v1 = vsel %vm345_vm2, %v344_v0, %v343_v63 }
 0x2cd   :  { %v347_v2 = vpack.c.b16 %v346_v1, %v346_v1 }
 0x2cf   :  { %405 = vmatmul.bf16.vlgmr.msra.gmra.mxu0 %v347_v2 }
 0x34c   :  { %v406_v4 = vpop.f32.mrf.mxu0 }
 0x34d   :  { %v407_v5 = vadd.f32 %v546_v3, %v406_v4 }
 0x34f   :  { %410 = vst [vmem:[#allocation10] sm:$0x3] %v407_v5 }
 0x350   :  { %421 = dma.vmem_to_hbm [thread:$0]  %s417_s18, 32, %s419_s21, [#allocation4]  }
 0x354   :  { %v408_v6 = vpop.f32.mrf.mxu0 }
 0x355   :  { %681 = dma.done.wait [#allocation4], 32  }
 0x356   :  { %682 = vsyncadd [#allocation4], 4294967264 }
 0x357   :  { %426 = vsyncpa [#allocation3], 1 }
 0x358   :  { %427 = vsyncpa [#allocation6], 1 }
 0x359   :  { %428 = vsyncpa [#allocation9], 1 }
 0x35a   :  { %429 = vsyncpa [#allocation4], 1 }

</bundles_post_ra>
